<compile_context>
chip_gen: v7x
topology: tpu7x:2x2x1
jax: 0.10.0
libtpu: 0.0.40
codegen_flags: <defaults>
</compile_context>

<pallas_src>
import functools

import jax
import jax.numpy as jnp
from jax.experimental import pallas as pl
from jax.experimental.pallas import tpu as pltpu


def _word_dropout_kernel(x_ref, keep_ref, o_ref, *, scale):
    # keep_ref: (TR, 1) in x dtype; 1.0 = keep word, 0.0 = drop word.
    # Fold the survivor scale into the tiny per-row mask, then one full-tile mul.
    keep_scaled = keep_ref[...] * jnp.asarray(scale, dtype=o_ref.dtype)  # (TR, 1)
    o_ref[...] = x_ref[...] * keep_scaled  # broadcast over emb_dim (lanes)


def word_embeddings_dropout(x, p: float, key=None, training: bool = True):
    """Pallas equivalent of WordEmbeddingsDropout.forward (nn.Dropout2d on (B, S, E))."""
    if (not training) or p == 0.0:
        return x
    if p >= 1.0:
        return jnp.zeros_like(x)
    if key is None:
        key = jax.random.PRNGKey(0)

    B, S, E = x.shape
    R = B * S
    x2 = x.reshape(R, E)

    # Per-(batch, word) keep mask: P(keep) = 1 - p. Whole words dropped (Dropout2d).
    keep = jax.random.bernoulli(key, p=1.0 - p, shape=(R, 1)).astype(x.dtype)

    # Row tile sized for ~4 MiB of x per block (amortizes per-grid-step overhead,
    # fits double-buffered in+out well under every generation's VMEM budget,
    # including v7x's 64 MiB).
    bytes_per_row = E * x2.dtype.itemsize
    target_block_bytes = 4 * 1024 * 1024
    tr = max(8, (target_block_bytes // max(1, bytes_per_row)) // 8 * 8)
    if R <= tr:
        tr = R  # single row-block; block shape == full dim is always legal

    kernel = functools.partial(_word_dropout_kernel, scale=float(1.0 / (1.0 - p)))

    out2 = pl.pallas_call(
        kernel,
        out_shape=jax.ShapeDtypeStruct((R, E), x.dtype),
        grid=(pl.cdiv(R, tr),),
        in_specs=[
            pl.BlockSpec((tr, E), lambda i: (i, 0)),
            pl.BlockSpec((tr, 1), lambda i: (i, 0)),
        ],
        out_specs=pl.BlockSpec((tr, E), lambda i: (i, 0)),
        compiler_params=pltpu.CompilerParams(
            dimension_semantics=("parallel",),          # rows independent -> 2 TCs on v7x
            vmem_limit_bytes=48 * 1024 * 1024,          # headroom for double-buffered blocks
        ),
    )(x2, keep)
    return out2.reshape(B, S, E)


if __name__ == "__main__":
    # Small shapes consistent with word-embedding usage: batch=2, words=8, emb_dim=128.
    root = jax.random.PRNGKey(0)
    key_x, key_mask = jax.random.split(root)

    B, S, E = 2, 8, 128
    p = 0.5
    x = jax.random.normal(key_x, (B, S, E), dtype=jnp.float32)

    y = jax.block_until_ready(word_embeddings_dropout(x, p=p, key=key_mask, training=True))

    # Sanity: every word row is either entirely zeroed or entirely scaled by 1/(1-p).
    scale = 1.0 / (1.0 - p)
    ok = True
    any_zero, any_kept = False, False
    for b in range(B):
        for s in range(S):
            row = y[b, s]
            zeroed = bool(jnp.all(row == 0.0))
            scaled = bool(jnp.allclose(row, x[b, s] * scale, rtol=1e-5, atol=1e-5))
            ok = ok and (zeroed or scaled)
            any_zero = any_zero or zeroed
            any_kept = any_kept or scaled
    assert ok, "rows must be fully dropped or fully scaled"
    assert any_kept, "with p=0.5 at least some rows should survive"

    # Eval mode is the identity; p=1 zeroes everything.
    y_eval = jax.block_until_ready(word_embeddings_dropout(x, p=p, training=False))
    assert bool(jnp.allclose(y_eval, x))
    y_all = jax.block_until_ready(word_embeddings_dropout(x, p=1.0, key=key_mask, training=True))
    assert bool(jnp.all(y_all == 0.0))

    print("KERNEL_OK")
</pallas_src>

<mosaic_0001>
module attributes {stable_mosaic.version = 11 : i64} {
  func.func @_word_dropout_kernel(%arg0: i32, %arg1: memref<16x128xf32, #tpu.memory_space<vmem>>, %arg2: memref<16x1xf32, #tpu.memory_space<vmem>>, %arg3: memref<16x128xf32, #tpu.memory_space<vmem>>) attributes {dimension_semantics = [#tpu.dimension_semantics<parallel>], iteration_bounds = array<i64: 1>, scalar_prefetch = 0 : i64, scratch_operands = 0 : i64, tpu.core_type = #tpu.core_type<tc>, window_params = [{transform_indices = @transform_0, window_bounds = array<i64: 16, 128>}, {transform_indices = @transform_1, window_bounds = array<i64: 16, 1>}, {transform_indices = @transform_2, window_bounds = array<i64: 16, 128>}]} {
    %c0 = arith.constant 0 : index
    %c0_0 = arith.constant 0 : index
    %0 = vector.load %arg2[%c0, %c0_0] : memref<16x1xf32, #tpu.memory_space<vmem>>, vector<16x1xf32>
    %cst = arith.constant 2.000000e+00 : f32
    %1 = vector.broadcast %cst : f32 to vector<16x1xf32>
    %2 = arith.mulf %0, %1 : vector<16x1xf32>
    %c0_1 = arith.constant 0 : index
    %c0_2 = arith.constant 0 : index
    %3 = vector.load %arg1[%c0_1, %c0_2] : memref<16x128xf32, #tpu.memory_space<vmem>>, vector<16x128xf32>
    %4 = vector.broadcast %2 : vector<16x1xf32> to vector<16x128xf32>
    %5 = arith.mulf %3, %4 : vector<16x128xf32>
    %c0_3 = arith.constant 0 : index
    %c0_4 = arith.constant 0 : index
    %6 = vector.load %arg3[%c0_3, %c0_4] : memref<16x128xf32, #tpu.memory_space<vmem>>, vector<16x128xf32>
    tpu.vector_store %arg3[%c0_3, %c0_4], %5 {strides = array<i32>} : memref<16x128xf32, #tpu.memory_space<vmem>>, vector<16x128xf32>,
    return
  }
  func.func @transform_0(%arg0: i32) -> (i32, i32) {
    %c0_i32 = arith.constant 0 : i32
    %c0_i32_0 = arith.constant 0 : i32
    return %arg0, %c0_i32 : i32, i32
  }
  func.func @transform_1(%arg0: i32) -> (i32, i32) {
    %c0_i32 = arith.constant 0 : i32
    %c0_i32_0 = arith.constant 0 : i32
    return %arg0, %c0_i32 : i32, i32
  }
  func.func @transform_2(%arg0: i32) -> (i32, i32) {
    %c0_i32 = arith.constant 0 : i32
    %c0_i32_0 = arith.constant 0 : i32
    return %arg0, %c0_i32 : i32, i32
  }
}

</mosaic_0001>

<bundles_post_ra>
// kernel: tpu_custom_call.1
= control target key start
LH: loop header
LB: loop body
LE: loop exit
PB: predicated region body
PF: predicated region fallthrough
CT: control target
= control target key end

     0   :  { %v77_v2 = vmov 0   ;;  %s120_s0 = inlined_call_operand.vmem [shape: f32[16,128], index: 0, kind: input, shape index: {}]   ;;  %s121_s1 = inlined_call_operand.vmem [shape: f32[16,1], index: 1, kind: input, shape index: {}]   ;;  %s122_s2 = inlined_call_operand.hbm [shape: f32[16,128], index: 2, kind: output, shape index: {}]  }
   0x1   :  { %v12_v0 = vld [vmem:[%s121_s1] sm:$0xff]  ;;  %v13_v1 = vld [vmem:[%s121_s1 + $0x8] sm:$0xff]  ;;  %52 = vset.pattern.permute.xlu0 %v77_v2 }
   0x2   :  { %v14_v3 = vmul.f32 2.0, %v12_v0 }
   0x3   :  { %7 = vsyncpa [#allocation3], 0  ;;  %v15_v4 = vmul.f32 2.0, %v13_v1  ;;  %v16_v5 = vld [vmem:[%s120_s0] sm:$0xff]  ;;  %s78_s15 = smov [#allocation2]   ;;  %v17_v8 = vld [vmem:[%s120_s0 + $0x8] sm:$0xff] }
   0x4   :  { %20 = vperm.xlu0 %52, %v14_v3   ;;  %s37_s16 = sshll.u32 %s78_s15, 4  ;;  %s38_s16 = int_to_ptr.vmem [resolvable:$true] %s37_s16 }
   0x5   :  { %s53_s1 = scalar_lea.vmem %s38_s16, 256  ;;  %p58_p1 = scmp.lt.s32.totalorder %s38_s16, %s38_s16 }
   0x6   :  { %p54_p0 = scmp.ne.s32.totalorder %s38_s16, %s53_s1  ;;  %p59_p2 = scmp.lt.s32.totalorder %s53_s1, %s53_s1 }
   0x8   :  { %25 = vperm.xlu0 %52, %v15_v4   ;;  %p60_p3 = por %p59_p2, %p58_p1 }
   0xa   :  { %p61_p4 = pnand %p60_p3, %p54_p0 }
  0x83   :  { %v21_v6 = vpop.permute.xlu0 %20 }
  0x84   :  { %v28_v7 = vmul.f32 %v21_v6, %v16_v5 }
  0x86   :  { %30 = vst [vmem:[#allocation2] sm:$0xff] %v28_v7 }
  0x87   :  { %v26_v9 = vpop.permute.xlu0 %25 }
  0x88   :  { %v29_v10 = vmul.f32 %v26_v9, %v17_v8 }
  0x8a   :  { %31 = vst [vmem:[#allocation2 + $0x8] sm:$0xff] %v29_v10 }
  0x8b   :  { %64 = shalt.err (!%p61_p4)
}
  0x8c   :  { %s65_s21 = scalar_lea.hbm %s122_s2, 256 }
  0x8d   :  { %p66_p5 = scmp.ne.s32.totalorder %s122_s2, %s65_s21  ;;  %p69_p6 = scmp.lt.u32.totalorder %s65_s21, %s122_s2 }
  0x8f   :  { %p71_p7 = pnand %p69_p6, %p66_p5 }
  0x91   :  { %74 = shalt.err (!%p71_p7)
}
  0x92   :  { %s79_s25 = smov 128   ;;  %s80_s26 = smov 8  }
  0x93   :  { %43 = dma.vmem_to_hbm [thread:$0]  %s38_s16, 256, %s122_s2, [#allocation3], %s79_s25, %s79_s25, %s80_s26  }
  0x94   :  { %75 = dma.done.wait [#allocation3], 256  }
  0x95   :  { %76 = vsyncadd [#allocation3], 4294967040 }
  0x96   :  { %47 = vsyncpa [#allocation3], 1 }

</bundles_post_ra>
